<compile_context>
chip_gen: v5e
topology: v5e:2x2
jax: 0.10.0
libtpu: 0.0.40
codegen_flags: <defaults>
</compile_context>

<pallas_src>
import jax
import jax.numpy as jnp
from jax.experimental import pallas as pl
from jax.experimental.pallas import tpu as pltpu


def _candle_lstm_kernel(x_ref, w_ih_ref, b_ref, w_hh_ref, post_scale_ref,
                        post_off_ref, w_fc_ref, b_fc_ref, out_ref):
    """LSTM recurrence + final FC + sigmoid for one padded batch tile.

    Gate order inside the kernel is [f, i, o, g] (one-time column permutation
    of the PyTorch [i, f, g, o] weights done in the wrapper), and the g-gate
    pre-activation columns of W_ih / W_hh / bias are pre-scaled by 2 so a
    single sigmoid over the whole (B, 4H) vreg yields all four gates after
    the cheap VPU fixup g = 2*sigmoid(2z) - 1.

    x_ref          : (T*B, D)  time-major flattened features (row = t*B + b)
    w_ih_ref       : (D, 4H)   input->gates weights, kernel gate order
    b_ref          : (1, 4H)   b_ih + b_hh combined, kernel gate order
    w_hh_ref       : (H, 4H)   hidden->gates weights, kernel gate order
    post_scale_ref : (1, 4H)   [1,1,1,2] per gate block (post-sigmoid fixup)
    post_off_ref   : (1, 4H)   [0,0,0,-1] per gate block
    w_fc_ref       : (O, H)    final linear weights (PyTorch layout)
    b_fc_ref       : (1, O)
    out_ref        : (B, O)
    """
    B = out_ref.shape[0]
    O = out_ref.shape[1]
    H = w_hh_ref.shape[0]
    T = x_ref.shape[0] // B
    H4 = 4 * H

    # ---- hoisted input projection: one (T*B, D) @ (D, 4H) MXU matmul ----
    xw = jnp.dot(x_ref[...], w_ih_ref[...],
                 preferred_element_type=jnp.float32) + b_ref[...]   # (T*B, 4H)

    # Loop-invariants hoisted (JAX does not CSE broadcast_in_dim inside the
    # unrolled loop, so broadcast once here).
    w_hh = w_hh_ref[...]                                            # (H, 4H)
    post_scale = jnp.broadcast_to(post_scale_ref[...], (B, H4))
    post_off = jnp.broadcast_to(post_off_ref[...], (B, H4))

    # TODO(synk): make W_hh weight-stationary on the MXU via
    # pltpu.matmul_push_rhs / matmul_acc_lhs / matmul_pop so the (H, 4H) RHS
    # is staged into the systolic array once instead of once per step.

    h = None
    c = None
    # ---- fully (statically) unrolled recurrence: T is small and static ----
    for t in range(T):
        if t == 0:
            # h == c == 0: skip the recurrent matmul, the add and f*c.
            gates = xw[0:B, :]
        else:
            gates = xw[t * B:(t + 1) * B, :] + jnp.dot(
                h, w_hh, preferred_element_type=jnp.float32)        # (B, 4H)

        # Single EUP pass over the full (B, 4H) vreg; VPU fixup turns the
        # (pre-doubled) g block into tanh.
        sig = jax.nn.sigmoid(gates)
        act = sig * post_scale + post_off          # [ f | i | o | tanh(g) ]

        # Half-width lane roll (direction-agnostic) puts o at lane offset 0
        # and aligns g with i; only the i*g product needs one realignment.
        rolled = pltpu.roll(act, shift=2 * H, axis=1)   # [ o | g | f | i ]
        f = act[:, 0:H]
        o = rolled[:, 0:H]
        ig = (act * rolled)[:, H:2 * H]                 # i * tanh(g)

        c = ig if t == 0 else f * c + ig
        h = o * jnp.tanh(c)

    # ---- final FC on last hidden state + sigmoid ----
    if O == 1:
        # O = 1: VPU multiply + lane reduction beats a 1-column MXU matmul.
        logits = jnp.sum(h * w_fc_ref[...], axis=1,
                         keepdims=True) + b_fc_ref[...]
    else:
        logits = jax.lax.dot_general(
            h, w_fc_ref[...], (((1,), (1,)), ((), ())),
            preferred_element_type=jnp.float32) + b_fc_ref[...]
    out_ref[...] = jax.nn.sigmoid(logits)


def _prep_gates(w, H):
    """Permute last (4H) dim from PyTorch order [i, f, g, o] to kernel order
    [f, i, o, g] and pre-scale the g block by 2 (tanh(z) = 2*sigmoid(2z)-1)."""
    i = w[..., 0:H]
    f = w[..., H:2 * H]
    g = w[..., 2 * H:3 * H]
    o = w[..., 3 * H:4 * H]
    return jnp.concatenate([f, i, o, 2.0 * g], axis=-1)


def candle_lstm_forward(params, x_candle, x_volume, x_day):
    # ---- glue: embedding lookups + concat (pure JAX) ----
    emb_c = params["embedding_candle"][x_candle]                    # (B, T, E)
    emb_d = params["embedding_day"][x_day]                          # (B, T, Ed)
    x = jnp.concatenate(
        [emb_c, x_volume[..., None].astype(jnp.float32), emb_d],
        axis=-1).astype(jnp.float32)                                # (B, T, D)

    B, T, D = x.shape
    H = params["w_hh"].shape[1]
    O = params["w_fc"].shape[0]

    # ---- pad batch to a full sublane tile (multiple of 8) ----
    B_pad = ((B + 7) // 8) * 8
    if B_pad != B:
        x = jnp.pad(x, ((0, B_pad - B), (0, 0), (0, 0)))

    # time-major, flattened: row t*B_pad + b  ->  (timestep t, batch b)
    x2d = jnp.transpose(x, (1, 0, 2)).reshape(T * B_pad, D)

    # ---- glue: transpose, gate-column permutation, tanh-fold pre-scale ----
    w_ih = _prep_gates(params["w_ih"].T.astype(jnp.float32), H)     # (D, 4H)
    w_hh = _prep_gates(params["w_hh"].T.astype(jnp.float32), H)     # (H, 4H)
    b = _prep_gates(
        (params["b_ih"] + params["b_hh"])[None, :].astype(jnp.float32), H)
    post_scale = jnp.concatenate(
        [jnp.ones((1, 3 * H), jnp.float32),
         jnp.full((1, H), 2.0, jnp.float32)], axis=-1)              # (1, 4H)
    post_off = jnp.concatenate(
        [jnp.zeros((1, 3 * H), jnp.float32),
         jnp.full((1, H), -1.0, jnp.float32)], axis=-1)             # (1, 4H)
    w_fc = params["w_fc"].astype(jnp.float32)                       # (O, H)
    b_fc = params["b_fc"][None, :].astype(jnp.float32)              # (1, O)

    vmem_spec = pl.BlockSpec(memory_space=pltpu.MemorySpace.VMEM)

    # Gridless call: the whole problem (<~200 KB) lives in VMEM on one core.
    # TODO(synk): for non-toy batch sizes add a batch-tile grid axis with
    # dimension_semantics=("parallel",) (second TensorCore on v7x), keep the
    # weight BlockSpecs constant-index (resident across the grid) and set
    # vmem_limit_bytes for v7x's 64 MiB VMEM; also cast matmul operands to
    # bf16 (f32 accumulation, f32 c/h state) on v6e/v7x once the hoisted
    # input projection dominates.
    out = pl.pallas_call(
        _candle_lstm_kernel,
        out_shape=jax.ShapeDtypeStruct((B_pad, O), jnp.float32),
        in_specs=[vmem_spec] * 8,
        out_specs=vmem_spec,
    )(x2d, w_ih, b, w_hh, post_scale, post_off, w_fc, b_fc)
    return out[:B]


def reference_forward(params, x_candle, x_volume, x_day):
    """Pure-JAX reference mirroring PyTorch CandleLSTM.forward."""
    emb_c = params["embedding_candle"][x_candle]
    emb_d = params["embedding_day"][x_day]
    x = jnp.concatenate(
        [emb_c, x_volume[..., None].astype(jnp.float32), emb_d], axis=-1)
    B, T, _ = x.shape
    H = params["w_hh"].shape[1]
    h = jnp.zeros((B, H), jnp.float32)
    c = jnp.zeros((B, H), jnp.float32)
    w_ih = params["w_ih"].T
    w_hh = params["w_hh"].T
    b = params["b_ih"] + params["b_hh"]
    for t in range(T):
        gates = x[:, t, :] @ w_ih + h @ w_hh + b
        i = jax.nn.sigmoid(gates[:, :H])
        f = jax.nn.sigmoid(gates[:, H:2 * H])
        g = jnp.tanh(gates[:, 2 * H:3 * H])
        o = jax.nn.sigmoid(gates[:, 3 * H:])
        c = f * c + i * g
        h = o * jnp.tanh(c)
    return jax.nn.sigmoid(h @ params["w_fc"].T + params["b_fc"])


if __name__ == "__main__":
    # Small, deterministic configuration consistent with the module's __init__.
    vocab_size, embedding_dim = 16, 8
    day_vocab_size, day_embedding_dim = 7, 4
    hidden_dim, output_dim = 32, 1
    B, T = 2, 8
    D = embedding_dim + 1 + day_embedding_dim  # LSTM input size

    key = jax.random.PRNGKey(0)
    keys = jax.random.split(key, 11)
    k = 1.0 / (hidden_dim ** 0.5)

    params = {
        # nn.Embedding default init: N(0, 1)
        "embedding_candle": jax.random.normal(
            keys[0], (vocab_size, embedding_dim), jnp.float32),
        "embedding_day": jax.random.normal(
            keys[1], (day_vocab_size, day_embedding_dim), jnp.float32),
        # nn.LSTM params: U(-1/sqrt(H), 1/sqrt(H)), PyTorch shapes
        "w_ih": jax.random.uniform(
            keys[2], (4 * hidden_dim, D), jnp.float32, -k, k),
        "w_hh": jax.random.uniform(
            keys[3], (4 * hidden_dim, hidden_dim), jnp.float32, -k, k),
        "b_ih": jax.random.uniform(
            keys[4], (4 * hidden_dim,), jnp.float32, -k, k),
        "b_hh": jax.random.uniform(
            keys[5], (4 * hidden_dim,), jnp.float32, -k, k),
        # nn.Linear params
        "w_fc": jax.random.uniform(
            keys[6], (output_dim, hidden_dim), jnp.float32, -k, k),
        "b_fc": jax.random.uniform(
            keys[7], (output_dim,), jnp.float32, -k, k),
    }

    x_candle = jax.random.randint(keys[8], (B, T), 0, vocab_size)
    x_day = jax.random.randint(keys[9], (B, T), 0, day_vocab_size)
    x_volume = jax.random.uniform(keys[10], (B, T), jnp.float32)

    out = candle_lstm_forward(params, x_candle, x_volume, x_day)
    out = jax.block_until_ready(out)

    ref = reference_forward(params, x_candle, x_volume, x_day)
    assert out.shape == (B, output_dim)
    assert jnp.allclose(out, ref, atol=2e-3), (out, ref)

    print("KERNEL_OK")
</pallas_src>

<mosaic_0001>
module attributes {stable_mosaic.version = 11 : i64} {
  func.func @_candle_lstm_kernel(%arg0: memref<64x13xf32, #tpu.memory_space<vmem>>, %arg1: memref<13x128xf32, #tpu.memory_space<vmem>>, %arg2: memref<1x128xf32, #tpu.memory_space<vmem>>, %arg3: memref<32x128xf32, #tpu.memory_space<vmem>>, %arg4: memref<1x128xf32, #tpu.memory_space<vmem>>, %arg5: memref<1x128xf32, #tpu.memory_space<vmem>>, %arg6: memref<1x32xf32, #tpu.memory_space<vmem>>, %arg7: memref<1x1xf32, #tpu.memory_space<vmem>>, %arg8: memref<8x1xf32, #tpu.memory_space<vmem>>) attributes {dimension_semantics = [], scalar_prefetch = 0 : i64, scratch_operands = 0 : i64, tpu.core_type = #tpu.core_type<tc>} {
    %c0 = arith.constant 0 : index
    %c0_0 = arith.constant 0 : index
    %0 = vector.load %arg0[%c0, %c0_0] : memref<64x13xf32, #tpu.memory_space<vmem>>, vector<64x13xf32>
    %c0_1 = arith.constant 0 : index
    %c0_2 = arith.constant 0 : index
    %1 = vector.load %arg1[%c0_1, %c0_2] : memref<13x128xf32, #tpu.memory_space<vmem>>, vector<13x128xf32>
    %cst = arith.constant dense<0.000000e+00> : vector<64x128xf32>
    %2 = tpu.matmul %0, %1, %cst {dimension_numbers = #tpu.dot_dimension_numbers<[1], [0], [0], [1], [0, 0, 1, 1], [], []>} : vector<64x13xf32>, vector<13x128xf32>, vector<64x128xf32> -> vector<64x128xf32>
    %c0_3 = arith.constant 0 : index
    %c0_4 = arith.constant 0 : index
    %3 = vector.load %arg2[%c0_3, %c0_4] : memref<1x128xf32, #tpu.memory_space<vmem>>, vector<1x128xf32>
    %4 = vector.broadcast %3 : vector<1x128xf32> to vector<64x128xf32>
    %5 = arith.addf %2, %4 : vector<64x128xf32>
    %c0_5 = arith.constant 0 : index
    %c0_6 = arith.constant 0 : index
    %6 = vector.load %arg3[%c0_5, %c0_6] : memref<32x128xf32, #tpu.memory_space<vmem>>, vector<32x128xf32>
    %c0_7 = arith.constant 0 : index
    %c0_8 = arith.constant 0 : index
    %7 = vector.load %arg4[%c0_7, %c0_8] : memref<1x128xf32, #tpu.memory_space<vmem>>, vector<1x128xf32>
    %8 = vector.shape_cast %7 : vector<1x128xf32> to vector<1x128xf32>
    %9 = vector.broadcast %8 : vector<1x128xf32> to vector<8x128xf32>
    %c0_9 = arith.constant 0 : index
    %c0_10 = arith.constant 0 : index
    %10 = vector.load %arg5[%c0_9, %c0_10] : memref<1x128xf32, #tpu.memory_space<vmem>>, vector<1x128xf32>
    %11 = vector.shape_cast %10 : vector<1x128xf32> to vector<1x128xf32>
    %12 = vector.broadcast %11 : vector<1x128xf32> to vector<8x128xf32>
    %13 = vector.extract_strided_slice %5 {offsets = [0, 0], sizes = [8, 128], strides = [1, 1]} : vector<64x128xf32> to vector<8x128xf32>
    %14 = arith.negf %13 : vector<8x128xf32>
    %15 = math.exp %14 : vector<8x128xf32>
    %cst_11 = arith.constant 1.000000e+00 : f32
    %16 = vector.broadcast %cst_11 : f32 to vector<8x128xf32>
    %17 = arith.addf %16, %15 : vector<8x128xf32>
    %18 = arith.divf %16, %17 : vector<8x128xf32>
    %19 = arith.mulf %18, %9 : vector<8x128xf32>
    %20 = arith.addf %19, %12 : vector<8x128xf32>
    %c64_i32 = arith.constant 64 : i32
    %21 = tpu.dynamic_rotate %20 by %c64_i32 dim 1 : vector<8x128xf32>, i32 -> vector<8x128xf32>
    %22 = vector.extract_strided_slice %21 {offsets = [0, 0], sizes = [8, 32], strides = [1, 1]} : vector<8x128xf32> to vector<8x32xf32>
    %23 = arith.mulf %20, %21 : vector<8x128xf32>
    %24 = vector.extract_strided_slice %23 {offsets = [0, 32], sizes = [8, 32], strides = [1, 1]} : vector<8x128xf32> to vector<8x32xf32>
    %25 = math.tanh %24 : vector<8x32xf32>
    %26 = arith.mulf %22, %25 : vector<8x32xf32>
    %27 = vector.extract_strided_slice %5 {offsets = [8, 0], sizes = [8, 128], strides = [1, 1]} : vector<64x128xf32> to vector<8x128xf32>
    %cst_12 = arith.constant dense<0.000000e+00> : vector<8x128xf32>
    %28 = tpu.matmul %26, %6, %cst_12 {dimension_numbers = #tpu.dot_dimension_numbers<[1], [0], [0], [1], [0, 0, 1, 1], [], []>} : vector<8x32xf32>, vector<32x128xf32>, vector<8x128xf32> -> vector<8x128xf32>
    %29 = arith.addf %27, %28 : vector<8x128xf32>
    %30 = arith.negf %29 : vector<8x128xf32>
    %31 = math.exp %30 : vector<8x128xf32>
    %cst_13 = arith.constant 1.000000e+00 : f32
    %32 = vector.broadcast %cst_13 : f32 to vector<8x128xf32>
    %33 = arith.addf %32, %31 : vector<8x128xf32>
    %34 = arith.divf %32, %33 : vector<8x128xf32>
    %35 = arith.mulf %34, %9 : vector<8x128xf32>
    %36 = arith.addf %35, %12 : vector<8x128xf32>
    %c64_i32_14 = arith.constant 64 : i32
    %37 = tpu.dynamic_rotate %36 by %c64_i32_14 dim 1 : vector<8x128xf32>, i32 -> vector<8x128xf32>
    %38 = vector.extract_strided_slice %36 {offsets = [0, 0], sizes = [8, 32], strides = [1, 1]} : vector<8x128xf32> to vector<8x32xf32>
    %39 = vector.extract_strided_slice %37 {offsets = [0, 0], sizes = [8, 32], strides = [1, 1]} : vector<8x128xf32> to vector<8x32xf32>
    %40 = arith.mulf %36, %37 : vector<8x128xf32>
    %41 = vector.extract_strided_slice %40 {offsets = [0, 32], sizes = [8, 32], strides = [1, 1]} : vector<8x128xf32> to vector<8x32xf32>
    %42 = arith.mulf %38, %24 : vector<8x32xf32>
    %43 = arith.addf %42, %41 : vector<8x32xf32>
    %44 = math.tanh %43 : vector<8x32xf32>
    %45 = arith.mulf %39, %44 : vector<8x32xf32>
    %46 = vector.extract_strided_slice %5 {offsets = [16, 0], sizes = [8, 128], strides = [1, 1]} : vector<64x128xf32> to vector<8x128xf32>
    %cst_15 = arith.constant dense<0.000000e+00> : vector<8x128xf32>
    %47 = tpu.matmul %45, %6, %cst_15 {dimension_numbers = #tpu.dot_dimension_numbers<[1], [0], [0], [1], [0, 0, 1, 1], [], []>} : vector<8x32xf32>, vector<32x128xf32>, vector<8x128xf32> -> vector<8x128xf32>
    %48 = arith.addf %46, %47 : vector<8x128xf32>
    %49 = arith.negf %48 : vector<8x128xf32>
    %50 = math.exp %49 : vector<8x128xf32>
    %cst_16 = arith.constant 1.000000e+00 : f32
    %51 = vector.broadcast %cst_16 : f32 to vector<8x128xf32>
    %52 = arith.addf %51, %50 : vector<8x128xf32>
    %53 = arith.divf %51, %52 : vector<8x128xf32>
    %54 = arith.mulf %53, %9 : vector<8x128xf32>
    %55 = arith.addf %54, %12 : vector<8x128xf32>
    %c64_i32_17 = arith.constant 64 : i32
    %56 = tpu.dynamic_rotate %55 by %c64_i32_17 dim 1 : vector<8x128xf32>, i32 -> vector<8x128xf32>
    %57 = vector.extract_strided_slice %55 {offsets = [0, 0], sizes = [8, 32], strides = [1, 1]} : vector<8x128xf32> to vector<8x32xf32>
    %58 = vector.extract_strided_slice %56 {offsets = [0, 0], sizes = [8, 32], strides = [1, 1]} : vector<8x128xf32> to vector<8x32xf32>
    %59 = arith.mulf %55, %56 : vector<8x128xf32>
    %60 = vector.extract_strided_slice %59 {offsets = [0, 32], sizes = [8, 32], strides = [1, 1]} : vector<8x128xf32> to vector<8x32xf32>
    %61 = arith.mulf %57, %43 : vector<8x32xf32>
    %62 = arith.addf %61, %60 : vector<8x32xf32>
    %63 = math.tanh %62 : vector<8x32xf32>
    %64 = arith.mulf %58, %63 : vector<8x32xf32>
    %65 = vector.extract_strided_slice %5 {offsets = [24, 0], sizes = [8, 128], strides = [1, 1]} : vector<64x128xf32> to vector<8x128xf32>
    %cst_18 = arith.constant dense<0.000000e+00> : vector<8x128xf32>
    %66 = tpu.matmul %64, %6, %cst_18 {dimension_numbers = #tpu.dot_dimension_numbers<[1], [0], [0], [1], [0, 0, 1, 1], [], []>} : vector<8x32xf32>, vector<32x128xf32>, vector<8x128xf32> -> vector<8x128xf32>
    %67 = arith.addf %65, %66 : vector<8x128xf32>
    %68 = arith.negf %67 : vector<8x128xf32>
    %69 = math.exp %68 : vector<8x128xf32>
    %cst_19 = arith.constant 1.000000e+00 : f32
    %70 = vector.broadcast %cst_19 : f32 to vector<8x128xf32>
    %71 = arith.addf %70, %69 : vector<8x128xf32>
    %72 = arith.divf %70, %71 : vector<8x128xf32>
    %73 = arith.mulf %72, %9 : vector<8x128xf32>
    %74 = arith.addf %73, %12 : vector<8x128xf32>
    %c64_i32_20 = arith.constant 64 : i32
    %75 = tpu.dynamic_rotate %74 by %c64_i32_20 dim 1 : vector<8x128xf32>, i32 -> vector<8x128xf32>
    %76 = vector.extract_strided_slice %74 {offsets = [0, 0], sizes = [8, 32], strides = [1, 1]} : vector<8x128xf32> to vector<8x32xf32>
    %77 = vector.extract_strided_slice %75 {offsets = [0, 0], sizes = [8, 32], strides = [1, 1]} : vector<8x128xf32> to vector<8x32xf32>
    %78 = arith.mulf %74, %75 : vector<8x128xf32>
    %79 = vector.extract_strided_slice %78 {offsets = [0, 32], sizes = [8, 32], strides = [1, 1]} : vector<8x128xf32> to vector<8x32xf32>
    %80 = arith.mulf %76, %62 : vector<8x32xf32>
    %81 = arith.addf %80, %79 : vector<8x32xf32>
    %82 = math.tanh %81 : vector<8x32xf32>
    %83 = arith.mulf %77, %82 : vector<8x32xf32>
    %84 = vector.extract_strided_slice %5 {offsets = [32, 0], sizes = [8, 128], strides = [1, 1]} : vector<64x128xf32> to vector<8x128xf32>
    %cst_21 = arith.constant dense<0.000000e+00> : vector<8x128xf32>
    %85 = tpu.matmul %83, %6, %cst_21 {dimension_numbers = #tpu.dot_dimension_numbers<[1], [0], [0], [1], [0, 0, 1, 1], [], []>} : vector<8x32xf32>, vector<32x128xf32>, vector<8x128xf32> -> vector<8x128xf32>
    %86 = arith.addf %84, %85 : vector<8x128xf32>
    %87 = arith.negf %86 : vector<8x128xf32>
    %88 = math.exp %87 : vector<8x128xf32>
    %cst_22 = arith.constant 1.000000e+00 : f32
    %89 = vector.broadcast %cst_22 : f32 to vector<8x128xf32>
    %90 = arith.addf %89, %88 : vector<8x128xf32>
    %91 = arith.divf %89, %90 : vector<8x128xf32>
    %92 = arith.mulf %91, %9 : vector<8x128xf32>
    %93 = arith.addf %92, %12 : vector<8x128xf32>
    %c64_i32_23 = arith.constant 64 : i32
    %94 = tpu.dynamic_rotate %93 by %c64_i32_23 dim 1 : vector<8x128xf32>, i32 -> vector<8x128xf32>
    %95 = vector.extract_strided_slice %93 {offsets = [0, 0], sizes = [8, 32], strides = [1, 1]} : vector<8x128xf32> to vector<8x32xf32>
    %96 = vector.extract_strided_slice %94 {offsets = [0, 0], sizes = [8, 32], strides = [1, 1]} : vector<8x128xf32> to vector<8x32xf32>
    %97 = arith.mulf %93, %94 : vector<8x128xf32>
    %98 = vector.extract_strided_slice %97 {offsets = [0, 32], sizes = [8, 32], strides = [1, 1]} : vector<8x128xf32> to vector<8x32xf32>
    %99 = arith.mulf %95, %81 : vector<8x32xf32>
    %100 = arith.addf %99, %98 : vector<8x32xf32>
    %101 = math.tanh %100 : vector<8x32xf32>
    %102 = arith.mulf %96, %101 : vector<8x32xf32>
    %103 = vector.extract_strided_slice %5 {offsets = [40, 0], sizes = [8, 128], strides = [1, 1]} : vector<64x128xf32> to vector<8x128xf32>
    %cst_24 = arith.constant dense<0.000000e+00> : vector<8x128xf32>
    %104 = tpu.matmul %102, %6, %cst_24 {dimension_numbers = #tpu.dot_dimension_numbers<[1], [0], [0], [1], [0, 0, 1, 1], [], []>} : vector<8x32xf32>, vector<32x128xf32>, vector<8x128xf32> -> vector<8x128xf32>
    %105 = arith.addf %103, %104 : vector<8x128xf32>
    %106 = arith.negf %105 : vector<8x128xf32>
    %107 = math.exp %106 : vector<8x128xf32>
    %cst_25 = arith.constant 1.000000e+00 : f32
    %108 = vector.broadcast %cst_25 : f32 to vector<8x128xf32>
    %109 = arith.addf %108, %107 : vector<8x128xf32>
    %110 = arith.divf %108, %109 : vector<8x128xf32>
    %111 = arith.mulf %110, %9 : vector<8x128xf32>
    %112 = arith.addf %111, %12 : vector<8x128xf32>
    %c64_i32_26 = arith.constant 64 : i32
    %113 = tpu.dynamic_rotate %112 by %c64_i32_26 dim 1 : vector<8x128xf32>, i32 -> vector<8x128xf32>
    %114 = vector.extract_strided_slice %112 {offsets = [0, 0], sizes = [8, 32], strides = [1, 1]} : vector<8x128xf32> to vector<8x32xf32>
    %115 = vector.extract_strided_slice %113 {offsets = [0, 0], sizes = [8, 32], strides = [1, 1]} : vector<8x128xf32> to vector<8x32xf32>
    %116 = arith.mulf %112, %113 : vector<8x128xf32>
    %117 = vector.extract_strided_slice %116 {offsets = [0, 32], sizes = [8, 32], strides = [1, 1]} : vector<8x128xf32> to vector<8x32xf32>
    %118 = arith.mulf %114, %100 : vector<8x32xf32>
    %119 = arith.addf %118, %117 : vector<8x32xf32>
    %120 = math.tanh %119 : vector<8x32xf32>
    %121 = arith.mulf %115, %120 : vector<8x32xf32>
    %122 = vector.extract_strided_slice %5 {offsets = [48, 0], sizes = [8, 128], strides = [1, 1]} : vector<64x128xf32> to vector<8x128xf32>
    %cst_27 = arith.constant dense<0.000000e+00> : vector<8x128xf32>
    %123 = tpu.matmul %121, %6, %cst_27 {dimension_numbers = #tpu.dot_dimension_numbers<[1], [0], [0], [1], [0, 0, 1, 1], [], []>} : vector<8x32xf32>, vector<32x128xf32>, vector<8x128xf32> -> vector<8x128xf32>
    %124 = arith.addf %122, %123 : vector<8x128xf32>
    %125 = arith.negf %124 : vector<8x128xf32>
    %126 = math.exp %125 : vector<8x128xf32>
    %cst_28 = arith.constant 1.000000e+00 : f32
    %127 = vector.broadcast %cst_28 : f32 to vector<8x128xf32>
    %128 = arith.addf %127, %126 : vector<8x128xf32>
    %129 = arith.divf %127, %128 : vector<8x128xf32>
    %130 = arith.mulf %129, %9 : vector<8x128xf32>
    %131 = arith.addf %130, %12 : vector<8x128xf32>
    %c64_i32_29 = arith.constant 64 : i32
    %132 = tpu.dynamic_rotate %131 by %c64_i32_29 dim 1 : vector<8x128xf32>, i32 -> vector<8x128xf32>
    %133 = vector.extract_strided_slice %131 {offsets = [0, 0], sizes = [8, 32], strides = [1, 1]} : vector<8x128xf32> to vector<8x32xf32>
    %134 = vector.extract_strided_slice %132 {offsets = [0, 0], sizes = [8, 32], strides = [1, 1]} : vector<8x128xf32> to vector<8x32xf32>
    %135 = arith.mulf %131, %132 : vector<8x128xf32>
    %136 = vector.extract_strided_slice %135 {offsets = [0, 32], sizes = [8, 32], strides = [1, 1]} : vector<8x128xf32> to vector<8x32xf32>
    %137 = arith.mulf %133, %119 : vector<8x32xf32>
    %138 = arith.addf %137, %136 : vector<8x32xf32>
    %139 = math.tanh %138 : vector<8x32xf32>
    %140 = arith.mulf %134, %139 : vector<8x32xf32>
    %141 = vector.extract_strided_slice %5 {offsets = [56, 0], sizes = [8, 128], strides = [1, 1]} : vector<64x128xf32> to vector<8x128xf32>
    %cst_30 = arith.constant dense<0.000000e+00> : vector<8x128xf32>
    %142 = tpu.matmul %140, %6, %cst_30 {dimension_numbers = #tpu.dot_dimension_numbers<[1], [0], [0], [1], [0, 0, 1, 1], [], []>} : vector<8x32xf32>, vector<32x128xf32>, vector<8x128xf32> -> vector<8x128xf32>
    %143 = arith.addf %141, %142 : vector<8x128xf32>
    %144 = arith.negf %143 : vector<8x128xf32>
    %145 = math.exp %144 : vector<8x128xf32>
    %cst_31 = arith.constant 1.000000e+00 : f32
    %146 = vector.broadcast %cst_31 : f32 to vector<8x128xf32>
    %147 = arith.addf %146, %145 : vector<8x128xf32>
    %148 = arith.divf %146, %147 : vector<8x128xf32>
    %149 = arith.mulf %148, %9 : vector<8x128xf32>
    %150 = arith.addf %149, %12 : vector<8x128xf32>
    %c64_i32_32 = arith.constant 64 : i32
    %151 = tpu.dynamic_rotate %150 by %c64_i32_32 dim 1 : vector<8x128xf32>, i32 -> vector<8x128xf32>
    %152 = vector.extract_strided_slice %150 {offsets = [0, 0], sizes = [8, 32], strides = [1, 1]} : vector<8x128xf32> to vector<8x32xf32>
    %153 = vector.extract_strided_slice %151 {offsets = [0, 0], sizes = [8, 32], strides = [1, 1]} : vector<8x128xf32> to vector<8x32xf32>
    %154 = arith.mulf %150, %151 : vector<8x128xf32>
    %155 = vector.extract_strided_slice %154 {offsets = [0, 32], sizes = [8, 32], strides = [1, 1]} : vector<8x128xf32> to vector<8x32xf32>
    %156 = arith.mulf %152, %138 : vector<8x32xf32>
    %157 = arith.addf %156, %155 : vector<8x32xf32>
    %158 = math.tanh %157 : vector<8x32xf32>
    %159 = arith.mulf %153, %158 : vector<8x32xf32>
    %c0_33 = arith.constant 0 : index
    %c0_34 = arith.constant 0 : index
    %160 = vector.load %arg6[%c0_33, %c0_34] : memref<1x32xf32, #tpu.memory_space<vmem>>, vector<1x32xf32>
    %161 = vector.broadcast %160 : vector<1x32xf32> to vector<8x32xf32>
    %162 = arith.mulf %159, %161 : vector<8x32xf32>
    %cst_35 = arith.constant dense<0.000000e+00> : vector<8xf32>
    %163 = vector.multi_reduction <add>, %162, %cst_35 [1] : vector<8x32xf32> to vector<8xf32>
    %164 = vector.shape_cast %163 : vector<8xf32> to vector<8x1xf32>
    %c0_36 = arith.constant 0 : index
    %c0_37 = arith.constant 0 : index
    %165 = vector.load %arg7[%c0_36, %c0_37] : memref<1x1xf32, #tpu.memory_space<vmem>>, vector<1x1xf32>
    %166 = vector.broadcast %165 : vector<1x1xf32> to vector<8x1xf32>
    %167 = arith.addf %164, %166 : vector<8x1xf32>
    %168 = arith.negf %167 : vector<8x1xf32>
    %169 = math.exp %168 : vector<8x1xf32>
    %cst_38 = arith.constant 1.000000e+00 : f32
    %170 = vector.broadcast %cst_38 : f32 to vector<8x1xf32>
    %171 = arith.addf %170, %169 : vector<8x1xf32>
    %172 = arith.divf %170, %171 : vector<8x1xf32>
    %c0_39 = arith.constant 0 : index
    %c0_40 = arith.constant 0 : index
    %173 = vector.load %arg8[%c0_39, %c0_40] : memref<8x1xf32, #tpu.memory_space<vmem>>, vector<8x1xf32>
    tpu.vector_store %arg8[%c0_39, %c0_40], %172 {strides = array<i32>} : memref<8x1xf32, #tpu.memory_space<vmem>>, vector<8x1xf32>,
    return
  }
}

</mosaic_0001>

<bundles_post_ra>
// kernel: tpu_custom_call.1
= control target key start
LH: loop header
LB: loop body
LE: loop exit
PB: predicated region body
PF: predicated region fallthrough
CT: control target
= control target key end

     0   :  { %vm70_vm0 = vcmask 1044480   ;;  %vm45_vm1 = vcmask 105472   ;;  %s680_s15 = smov 64   ;;  %s681_s20 = smov 96   ;;  %vm157_vm6 = vcmask 261120   ;;  %s898_s1 = inlined_call_operand.vmem [shape: f32[13,128], index: 1, kind: input, shape index: {}]   ;;  %s899_s0 = inlined_call_operand.vmem [shape: f32[64,13], index: 0, kind: input, shape index: {}]   ;;  %s900_s2 = inlined_call_operand.vmem [shape: f32[1,128], index: 2, kind: input, shape index: {}]   ;;  %s901_s4 = inlined_call_operand.vmem [shape: f32[1,128], index: 4, kind: input, shape index: {}]   ;;  %s902_s5 = inlined_call_operand.vmem [shape: f32[1,128], index: 5, kind: input, shape index: {}]   ;;  %s903_s3 = inlined_call_operand.vmem [shape: f32[32,128], index: 3, kind: input, shape index: {}]   ;;  %s904_s6 = inlined_call_operand.vmem [shape: f32[1,32], index: 6, kind: input, shape index: {}]   ;;  %s905_s7 = inlined_call_operand.<no memory space> [shape: f32[1,1], index: 7, kind: input, shape index: {}]   ;;  %s906_s8 = inlined_call_operand.vmem [shape: f32[8,1], index: 8, kind: output, shape index: {}]  }
   0x1   :  { %v40_v0 = vld [vmem:[%s898_s1 + $0x8] sm:$0x1f]  ;;  %v39_v1 = vld [vmem:[%s898_s1] sm:$0xff]  ;;  %v759_v23 = vld [vmem:[%s903_s3 + $0x18] sm:$0xff] }
   0x2   :  { %592 = vmatpush.msk.msra.mxu0 %vm70_vm0, %v40_v0  ;;  %v31_v2 = vld [vmem:[%s899_s0] sm:$0xff]  ;;  %617 = vmatpush.msk.msra.mxu2 %vm70_vm0, %v40_v0  ;;  %v764_v24 = vld [vmem:[%s903_s3 + $0x10] sm:$0xff]  ;;  %v771_v25 = vld [vmem:[%s903_s3 + $0x8] sm:$0xff] }
   0x3   :  { %618 = vmatpush.msk.msra.mxu3 %vm70_vm0, %v40_v0  ;;  %v740_v3 = vld [vmem:[%s900_s2] ss:$0 sm:$0xff]  ;;  %173 = vmatpush.msra.mxu1 %v759_v23  ;;  %v32_v29 = vld [vmem:[%s899_s0 + $0x8] sm:$0xff]  ;;  %v33_v56 = vld [vmem:[%s899_s0 + $0x10] sm:$0xff] }
   0x4   :  { %89 = vmatpush.msra.mxu0 %v39_v1  ;;  %619 = vmatpush.msra.mxu2 %v39_v1  ;;  %v746_v15 = vld [vmem:[%s901_s4] ss:$0 sm:$0xff]  ;;  %v36_v55 = vld [vmem:[%s899_s0 + $0x28] sm:$0xff] }
   0x5   :  { %593 = vmatmul.msk.f32.vlgmr.msra.gmra.mxu0 %vm45_vm1, %v31_v2  ;;  %620 = vmatpush.msra.mxu3 %v39_v1  ;;  %v751_v18 = vld [vmem:[%s902_s5] ss:$0 sm:$0xff] }
   0x6   :  { %233 = vmatpush.msrb.mxu2 %v759_v23  ;;  %174 = vmatpush.msra.mxu1 %v764_v24  ;;  %v788_v30 = vld [vmem:[%s903_s3] sm:$0xff] }
   0x7   :  { %289 = vmatpush.msrb.mxu3 %v759_v23  ;;  %v35_v52 = vld [vmem:[%s899_s0 + $0x20] sm:$0xff] }
   0x8   :  { %234 = vmatpush.msrb.mxu2 %v764_v24  ;;  %175 = vmatpush.msra.mxu1 %v771_v25 }
   0x9   :  { %290 = vmatpush.msrb.mxu3 %v764_v24  ;;  %597 = vmatmul.msk.f32.vlgmr.msra.gmra.mxu2 %vm45_vm1, %v35_v52 }
   0xa   :  { %235 = vmatpush.msrb.mxu2 %v771_v25  ;;  %176 = vmatpush.msra.mxu1 %v788_v30 }
   0xb   :  { %291 = vmatpush.msrb.mxu3 %v771_v25 }
   0xc   :  { %236 = vmatpush.msrb.mxu2 %v788_v30  ;;  %345 = vmatpush.msrb.mxu1 %v759_v23 }
   0xd   :  { %594 = vmatmul.msk.f32.gmra.mxu0 %vm45_vm1, %v32_v29  ;;  %292 = vmatpush.msrb.mxu3 %v788_v30  ;;  %v38_v29 = vld [vmem:[%s899_s0 + $0x38] sm:$0xff] }
   0xe   :  { %346 = vmatpush.msrb.mxu1 %v764_v24  ;;  %401 = vmatpush.msra.mxu2 %v759_v23 }
  0x10   :  { %347 = vmatpush.msrb.mxu1 %v771_v25  ;;  %402 = vmatpush.msra.mxu2 %v764_v24 }
  0x11   :  { %598 = vmatmul.msk.f32.gmra.mxu2 %vm45_vm1, %v36_v55 }
  0x12   :  { %348 = vmatpush.msrb.mxu1 %v788_v30  ;;  %403 = vmatpush.msra.mxu2 %v771_v25 }
  0x14   :  { %404 = vmatpush.msra.mxu2 %v788_v30 }
  0x15   :  { %595 = vmatmul.msk.f32.gmra.mxu0 %vm45_vm1, %v33_v56 }
  0x82   :  { %v91_v4 = vpop.f32.mrf.mxu0 }
  0x83   :  { %v92_v5 = vadd.f32 %v740_v3, %v91_v4 }
  0x85   :  { %v601_v6 = vmul.f32 -1.442695, %v92_v5 }
  0x87   :  { %628 = vpow2.f32 %v601_v6 }
  0x8a   :  { %v94_v33 = vpop.f32.mrf.mxu0 }
  0x8b   :  { %v95_v34 = vadd.f32 %v740_v3, %v94_v33 }
  0x8c   :  { %v825_v63 = vpop.f32.mrf.mxu2 }
  0x8d   :  { %v629_v7 = vpop.eup %628 }
  0x8e   :  { %v130_v8 = vadd.f32 1.0, %v629_v7 }
  0x90   :  { %630 = vrcp.f32 %v130_v8  ;;  %v142_v12 = vand.u32 2147483648, %v130_v8  ;;  %v140_v14 = vand.u32 2147483647, %v130_v8  ;;  %vm136_vm3 = vweird.f32 %v130_v8 }
  0x92   :  { %v143_v17 = vor.u32 1.1754944e-38, %v142_v12  ;;  %vm141_vm5 = vcmp.eq.f32.partialorder %v140_v14, 8.507059e+37  ;;  %v97_v1 = vpop.f32.mrf.mxu0 }
  0x93   :  { %v98_v2 = vadd.f32 %v740_v3, %v97_v1 }
  0x94   :  { %v827_v0 = vpop.f32.mrf.mxu2 }
  0x96   :  { %v631_v9 = vpop.eup %630 }
  0x97   :  { %v132_v10 = vmul.f32 %v631_v9, %v130_v8  ;;  %vm137_vm2 = vweird.f32 %v631_v9 }
  0x98   :  { %vm138_vm4 = vmor %vm136_vm3, %vm137_vm2 }
  0x99   :  { %v133_v11 = vsub.f32 1.0, %v132_v10 }
  0x9b   :  { %v134_v13 = vmul.f32 %v631_v9, %v133_v11 }
  0x9d   :  { %v135_v16 = vadd.f32 %v631_v9, %v134_v13 }
  0x9f   :  { %v139_v19 = vsel %vm138_vm4, %v631_v9, %v135_v16 }
  0xa0   :  { %v144_v20 = vsel %vm141_vm5, %v143_v17, %v139_v19 }
  0xa1   :  { %v146_v21 = vmul.f32 %v746_v15, %v144_v20 }
  0xa3   :  { %v147_v22 = vadd.f32 %v751_v18, %v146_v21 }
  0xa5   :  { %148 = vrot.lane.b32.xlu0 %v147_v22, %s680_s15 }
 0x117   :  { %v149_v26 = vpop.permute.xlu0 %148 }
 0x118   :  { %v150_v27 = vmul.f32 %v149_v26, %v147_v22 }
 0x11a   :  { %632 = vtanh.f32 %v150_v27 }
 0x120   :  { %v633_v28 = vpop.eup %632 }
 0x121   :  { %153 = vrot.lane.b32.xlu0 %v633_v28, %s681_s20 }
 0x193   :  { %v154_v31 = vpop.permute.xlu0 %153 }
 0x194   :  { %v156_v32 = vmul.f32 %v154_v31, %v149_v26  ;;  %v37_v26 = vld [vmem:[%s899_s0 + $0x30] sm:$0xff] }
 0x195   :  { %599 = vmatmul.msk.f32.vlgmr.msra.gmra.mxu3 %vm45_vm1, %v37_v26 }
 0x196   :  { %602 = vmatmul.msk.f32.vlgmr.msra.gmra.mxu1 %vm157_vm6, %v156_v32  ;;  %457 = vmatpush.msra.mxu3 %v759_v23 }
 0x197   :  { %513 = vmatpush.msra.mxu1 %v759_v23  ;;  %v34_v23 = vld [vmem:[%s899_s0 + $0x18] sm:$0xff] }
 0x198   :  { %458 = vmatpush.msra.mxu3 %v764_v24  ;;  %596 = vmatmul.msk.f32.gmra.mxu0 %vm45_vm1, %v34_v23 }
 0x199   :  { %514 = vmatpush.msra.mxu1 %v764_v24 }
 0x19a   :  { %459 = vmatpush.msra.mxu3 %v771_v25 }
 0x19b   :  { %515 = vmatpush.msra.mxu1 %v771_v25 }
 0x19c   :  { %460 = vmatpush.msra.mxu3 %v788_v30 }
 0x19d   :  { %516 = vmatpush.msra.mxu1 %v788_v30  ;;  %600 = vmatmul.msk.f32.gmra.mxu3 %vm45_vm1, %v38_v29  ;;  %v107_v29 = vadd.f32 %v740_v3, %v827_v0 }
 0x213   :  { %v178_v35 = vpop.f32.mrf.mxu1 }
 0x214   :  { %v181_v36 = vadd.f32 %v178_v35, %v95_v34 }
 0x215   :  { %v100_v35 = vpop.f32.mrf.mxu0 }
 0x216   :  { %v603_v37 = vmul.f32 -1.442695, %v181_v36  ;;  %v101_v36 = vadd.f32 %v740_v3, %v100_v35 }
 0x218   :  { %634 = vpow2.f32 %v603_v37  ;;  %v851_v33 = vpop.f32.mrf.mxu3 }
 0x21e   :  { %v635_v38 = vpop.eup %634 }
 0x21f   :  { %v185_v39 = vadd.f32 1.0, %v635_v38 }
 0x220   :  { %v853_v34 = vpop.f32.mrf.mxu3 }
 0x221   :  { %636 = vrcp.f32 %v185_v39  ;;  %v197_v43 = vand.u32 2147483648, %v185_v39  ;;  %v195_v45 = vand.u32 2147483647, %v185_v39  ;;  %vm191_vm8 = vweird.f32 %v185_v39 }
 0x223   :  { %v198_v47 = vor.u32 1.1754944e-38, %v197_v43  ;;  %vm196_vm10 = vcmp.eq.f32.partialorder %v195_v45, 8.507059e+37 }
 0x227   :  { %v637_v40 = vpop.eup %636 }
 0x228   :  { %v187_v41 = vmul.f32 %v637_v40, %v185_v39  ;;  %vm192_vm7 = vweird.f32 %v637_v40 }
 0x229   :  { %vm193_vm9 = vmor %vm191_vm8, %vm192_vm7 }
 0x22a   :  { %v188_v42 = vsub.f32 1.0, %v187_v41 }
 0x22c   :  { %v189_v44 = vmul.f32 %v637_v40, %v188_v42 }
 0x22e   :  { %v190_v46 = vadd.f32 %v637_v40, %v189_v44 }
 0x230   :  { %v194_v48 = vsel %vm193_vm9, %v637_v40, %v190_v46 }
 0x231   :  { %v199_v49 = vsel %vm196_vm10, %v198_v47, %v194_v48 }
 0x232   :  { %v201_v50 = vmul.f32 %v746_v15, %v199_v49 }
 0x234   :  { %v202_v51 = vadd.f32 %v751_v18, %v201_v50 }
 0x236   :  { %203 = vrot.lane.b32.xlu1 %v202_v51, %s680_s15 }
 0x23e   :  { %207 = vrot.lane.b32.xlu1 %v150_v27, %s681_s20 }
 0x2a8   :  { %v204_v53 = vpop.permute.xlu1 %203 }
 0x2a9   :  { %v205_v54 = vmul.f32 %v204_v53, %v202_v51 }
 0x2ab   :  { %212 = vrot.lane.b32.xlu2 %v205_v54, %s681_s20 }
 0x2b0   :  { %v208_v57 = vpop.permute.xlu1 %207 }
 0x2b1   :  { %v210_v58 = vmul.f32 %v208_v57, %v202_v51 }
 0x305   :  { %v213_v59 = vpop.permute.xlu2 %212 }
 0x306   :  { %v215_v60 = vadd.f32 %v213_v59, %v210_v58 }
 0x308   :  { %638 = vtanh.f32 %v215_v60 }
 0x30e   :  { %v639_v61 = vpop.eup %638 }
 0x30f   :  { %v217_v62 = vmul.f32 %v639_v61, %v204_v53  ;;  %v104_v61 = vadd.f32 %v740_v3, %v825_v63 }
 0x311   :  { %604 = vmatmul.msk.f32.vlgmr.msrb.gmra.mxu2 %vm157_vm6, %v217_v62 }
 0x394   :  { %v238_v4 = vpop.f32.mrf.mxu2 }
 0x395   :  { %v241_v5 = vadd.f32 %v238_v4, %v98_v2 }
 0x397   :  { %v605_v6 = vmul.f32 -1.442695, %v241_v5 }
 0x399   :  { %640 = vpow2.f32 %v605_v6 }
 0x39f   :  { %v641_v7 = vpop.eup %640 }
 0x3a0   :  { %v245_v8 = vadd.f32 1.0, %v641_v7 }
 0x3a2   :  { %642 = vrcp.f32 %v245_v8  ;;  %v257_v12 = vand.u32 2147483648, %v245_v8  ;;  %v255_v14 = vand.u32 2147483647, %v245_v8  ;;  %vm251_vm12 = vweird.f32 %v245_v8 }
 0x3a4   :  { %v258_v17 = vor.u32 1.1754944e-38, %v257_v12  ;;  %vm256_vm14 = vcmp.eq.f32.partialorder %v255_v14, 8.507059e+37 }
 0x3a8   :  { %v643_v9 = vpop.eup %642 }
 0x3a9   :  { %v247_v10 = vmul.f32 %v643_v9, %v245_v8  ;;  %vm252_vm11 = vweird.f32 %v643_v9 }
 0x3aa   :  { %vm253_vm13 = vmor %vm251_vm12, %vm252_vm11 }
 0x3ab   :  { %v248_v11 = vsub.f32 1.0, %v247_v10 }
 0x3ad   :  { %v249_v13 = vmul.f32 %v643_v9, %v248_v11 }
 0x3af   :  { %v250_v16 = vadd.f32 %v643_v9, %v249_v13 }
 0x3b1   :  { %v254_v19 = vsel %vm253_vm13, %v643_v9, %v250_v16 }
 0x3b2   :  { %v259_v20 = vsel %vm256_vm14, %v258_v17, %v254_v19 }
 0x3b3   :  { %v261_v21 = vmul.f32 %v746_v15, %v259_v20 }
 0x3b5   :  { %v262_v22 = vadd.f32 %v751_v18, %v261_v21 }
 0x3b7   :  { %263 = vrot.lane.b32.xlu2 %v262_v22, %s680_s15  ;;  %v266_v24 = vmul.f32 %v262_v22, %v215_v60 }
 0x411   :  { %v264_v27 = vpop.permute.xlu2 %263 }
 0x412   :  { %v265_v28 = vmul.f32 %v264_v27, %v262_v22 }
 0x414   :  { %268 = vrot.lane.b32.xlu0 %v265_v28, %s681_s20 }
 0x486   :  { %v269_v25 = vpop.permute.xlu0 %268 }
 0x487   :  { %v271_v31 = vadd.f32 %v269_v25, %v266_v24 }
 0x489   :  { %644 = vtanh.f32 %v271_v31 }
 0x48f   :  { %v645_v30 = vpop.eup %644 }
 0x490   :  { %v273_v32 = vmul.f32 %v645_v30, %v264_v27 }
 0x492   :  { %606 = vmatmul.msk.f32.vlgmr.msrb.gmra.mxu3 %vm157_vm6, %v273_v32 }
 0x515   :  { %v294_v37 = vpop.f32.mrf.mxu3 }
 0x516   :  { %v297_v38 = vadd.f32 %v294_v37, %v101_v36 }
 0x518   :  { %v607_v39 = vmul.f32 -1.442695, %v297_v38 }
 0x51a   :  { %646 = vpow2.f32 %v607_v39 }
 0x520   :  { %v647_v40 = vpop.eup %646 }
 0x521   :  { %v301_v41 = vadd.f32 1.0, %v647_v40 }
 0x523   :  { %648 = vrcp.f32 %v301_v41  ;;  %v313_v45 = vand.u32 2147483648, %v301_v41  ;;  %v311_v47 = vand.u32 2147483647, %v301_v41  ;;  %vm307_vm0 = vweird.f32 %v301_v41 }
 0x525   :  { %v314_v49 = vor.u32 1.1754944e-38, %v313_v45  ;;  %vm312_vm2 = vcmp.eq.f32.partialorder %v311_v47, 8.507059e+37 }
 0x529   :  { %v649_v42 = vpop.eup %648 }
 0x52a   :  { %v303_v43 = vmul.f32 %v649_v42, %v301_v41  ;;  %vm308_vm15 = vweird.f32 %v649_v42 }
 0x52b   :  { %vm309_vm1 = vmor %vm307_vm0, %vm308_vm15 }
 0x52c   :  { %v304_v44 = vsub.f32 1.0, %v303_v43 }
 0x52e   :  { %v305_v46 = vmul.f32 %v649_v42, %v304_v44 }
 0x530   :  { %v306_v48 = vadd.f32 %v649_v42, %v305_v46 }
 0x532   :  { %v310_v50 = vsel %vm309_vm1, %v649_v42, %v306_v48 }
 0x533   :  { %v315_v51 = vsel %vm312_vm2, %v314_v49, %v310_v50 }
 0x534   :  { %v317_v52 = vmul.f32 %v746_v15, %v315_v51 }
 0x536   :  { %v318_v53 = vadd.f32 %v751_v18, %v317_v52  ;;  %v110_v52 = vadd.f32 %v740_v3, %v851_v33 }
 0x538   :  { %319 = vrot.lane.b32.xlu1 %v318_v53, %s680_s15  ;;  %v322_v56 = vmul.f32 %v318_v53, %v271_v31 }
 0x5aa   :  { %v320_v54 = vpop.permute.xlu1 %319 }
 0x5ab   :  { %v321_v55 = vmul.f32 %v320_v54, %v318_v53 }
 0x5ad   :  { %324 = vrot.lane.b32.xlu2 %v321_v55, %s681_s20 }
 0x607   :  { %v325_v57 = vpop.permute.xlu2 %324 }
 0x608   :  { %v327_v58 = vadd.f32 %v325_v57, %v322_v56 }
 0x60a   :  { %650 = vtanh.f32 %v327_v58 }
 0x610   :  { %v651_v59 = vpop.eup %650 }
 0x611   :  { %v329_v60 = vmul.f32 %v651_v59, %v320_v54 }
 0x613   :  { %608 = vmatmul.msk.f32.vlgmr.msrb.gmra.mxu1 %vm157_vm6, %v329_v60 }
 0x690   :  { %v350_v62 = vpop.f32.mrf.mxu1 }
 0x691   :  { %v353_v1 = vadd.f32 %v350_v62, %v104_v61 }
 0x693   :  { %v609_v2 = vmul.f32 -1.442695, %v353_v1 }
 0x695   :  { %652 = vpow2.f32 %v609_v2 }
 0x69b   :  { %v653_v4 = vpop.eup %652 }
 0x69c   :  { %v357_v5 = vadd.f32 1.0, %v653_v4 }
 0x69e   :  { %654 = vrcp.f32 %v357_v5  ;;  %v369_v9 = vand.u32 2147483648, %v357_v5  ;;  %v367_v11 = vand.u32 2147483647, %v357_v5  ;;  %vm363_vm4 = vweird.f32 %v357_v5 }
 0x6a0   :  { %v370_v13 = vor.u32 1.1754944e-38, %v369_v9  ;;  %vm368_vm7 = vcmp.eq.f32.partialorder %v367_v11, 8.507059e+37 }
 0x6a4   :  { %v655_v6 = vpop.eup %654 }
 0x6a5   :  { %v359_v7 = vmul.f32 %v655_v6, %v357_v5  ;;  %vm364_vm3 = vweird.f32 %v655_v6 }
 0x6a6   :  { %vm365_vm5 = vmor %vm363_vm4, %vm364_vm3 }
 0x6a7   :  { %v360_v8 = vsub.f32 1.0, %v359_v7 }
 0x6a9   :  { %v361_v10 = vmul.f32 %v655_v6, %v360_v8 }
 0x6ab   :  { %v362_v12 = vadd.f32 %v655_v6, %v361_v10 }
 0x6ad   :  { %v366_v14 = vsel %vm365_vm5, %v655_v6, %v362_v12 }
 0x6ae   :  { %v371_v63 = vsel %vm368_vm7, %v370_v13, %v366_v14  ;;  %vm586_vm7 = vcmask 7168  }
 0x6af   :  { %v373_v16 = vmul.f32 %v746_v15, %v371_v63  ;;  %v113_v63 = vadd.f32 %v740_v3, %v853_v34 }
 0x6b1   :  { %v374_v17 = vadd.f32 %v751_v18, %v373_v16 }
 0x6b3   :  { %375 = vrot.lane.b32.xlu0 %v374_v17, %s680_s15  ;;  %v378_v21 = vmul.f32 %v374_v17, %v327_v58 }
 0x725   :  { %v376_v19 = vpop.permute.xlu0 %375 }
 0x726   :  { %v377_v20 = vmul.f32 %v376_v19, %v374_v17 }
 0x728   :  { %380 = vrot.lane.b32.xlu1 %v377_v20, %s681_s20 }
 0x79a   :  { %v381_v22 = vpop.permute.xlu1 %380 }
 0x79b   :  { %v383_v26 = vadd.f32 %v381_v22, %v378_v21 }
 0x79d   :  { %656 = vtanh.f32 %v383_v26 }
 0x7a3   :  { %v657_v27 = vpop.eup %656 }
 0x7a4   :  { %v385_v28 = vmul.f32 %v657_v27, %v376_v19 }
 0x7a6   :  { %610 = vmatmul.msk.f32.vlgmr.msra.gmra.mxu2 %vm157_vm6, %v385_v28 }
 0x829   :  { %v406_v23 = vpop.f32.mrf.mxu2 }
 0x82a   :  { %v409_v24 = vadd.f32 %v406_v23, %v107_v29 }
 0x82c   :  { %v611_v25 = vmul.f32 -1.442695, %v409_v24 }
 0x82e   :  { %658 = vpow2.f32 %v611_v25 }
 0x834   :  { %v659_v31 = vpop.eup %658 }
 0x835   :  { %v413_v30 = vadd.f32 1.0, %v659_v31 }
 0x837   :  { %660 = vrcp.f32 %v413_v30  ;;  %v425_v37 = vand.u32 2147483648, %v413_v30  ;;  %v423_v39 = vand.u32 2147483647, %v413_v30  ;;  %vm419_vm9 = vweird.f32 %v413_v30 }
 0x839   :  { %v426_v41 = vor.u32 1.1754944e-38, %v425_v37  ;;  %vm424_vm11 = vcmp.eq.f32.partialorder %v423_v39, 8.507059e+37 }
 0x83d   :  { %v661_v32 = vpop.eup %660 }
 0x83e   :  { %v415_v35 = vmul.f32 %v661_v32, %v413_v30  ;;  %vm420_vm8 = vweird.f32 %v661_v32 }
 0x83f   :  { %vm421_vm10 = vmor %vm419_vm9, %vm420_vm8 }
 0x840   :  { %v416_v36 = vsub.f32 1.0, %v415_v35 }
 0x842   :  { %v417_v38 = vmul.f32 %v661_v32, %v416_v36  ;;  %v13_v36 = vstv %s905_s7 }
 0x843   :  { %14 = vst [vmem:[#allocation2] sm:$0x1] %v13_v36 }
 0x844   :  { %v418_v40 = vadd.f32 %v661_v32, %v417_v38 }
 0x846   :  { %v422_v42 = vsel %vm421_vm10, %v661_v32, %v418_v40 }
 0x847   :  { %v427_v0 = vsel %vm424_vm11, %v426_v41, %v422_v42 }
 0x848   :  { %v429_v43 = vmul.f32 %v746_v15, %v427_v0 }
 0x84a   :  { %v430_v44 = vadd.f32 %v751_v18, %v429_v43  ;;  %v627_v0 = vld [vmem:[#allocation2] ss:$0 sm:$0xff] }
 0x84c   :  { %431 = vrot.lane.b32.xlu2 %v430_v44, %s680_s15  ;;  %v434_v47 = vmul.f32 %v430_v44, %v383_v26 }
 0x8a6   :  { %v432_v45 = vpop.permute.xlu2 %431 }
 0x8a7   :  { %v433_v46 = vmul.f32 %v432_v45, %v430_v44 }
 0x8a9   :  { %436 = vrot.lane.b32.xlu0 %v433_v46, %s681_s20 }
 0x91b   :  { %v437_v48 = vpop.permute.xlu0 %436 }
 0x91c   :  { %v439_v49 = vadd.f32 %v437_v48, %v434_v47 }
 0x91e   :  { %662 = vtanh.f32 %v439_v49 }
 0x924   :  { %v663_v50 = vpop.eup %662 }
 0x925   :  { %v441_v51 = vmul.f32 %v663_v50, %v432_v45 }
 0x927   :  { %612 = vmatmul.msk.f32.vlgmr.msra.gmra.mxu3 %vm157_vm6, %v441_v51 }
 0x9aa   :  { %v462_v53 = vpop.f32.mrf.mxu3 }
 0x9ab   :  { %v465_v54 = vadd.f32 %v462_v53, %v110_v52 }
 0x9ad   :  { %v613_v55 = vmul.f32 -1.442695, %v465_v54 }
 0x9af   :  { %664 = vpow2.f32 %v613_v55 }
 0x9b5   :  { %v665_v56 = vpop.eup %664 }
 0x9b6   :  { %v469_v57 = vadd.f32 1.0, %v665_v56 }
 0x9b8   :  { %666 = vrcp.f32 %v469_v57  ;;  %v481_v61 = vand.u32 2147483648, %v469_v57  ;;  %v479_v1 = vand.u32 2147483647, %v469_v57  ;;  %vm475_vm13 = vweird.f32 %v469_v57 }
 0x9ba   :  { %v482_v4 = vor.u32 1.1754944e-38, %v481_v61  ;;  %vm480_vm15 = vcmp.eq.f32.partialorder %v479_v1, 8.507059e+37 }
 0x9be   :  { %v667_v58 = vpop.eup %666 }
 0x9bf   :  { %v471_v59 = vmul.f32 %v667_v58, %v469_v57  ;;  %vm476_vm12 = vweird.f32 %v667_v58 }
 0x9c0   :  { %vm477_vm14 = vmor %vm475_vm13, %vm476_vm12 }
 0x9c1   :  { %v472_v60 = vsub.f32 1.0, %v471_v59 }
 0x9c3   :  { %v473_v62 = vmul.f32 %v667_v58, %v472_v60 }
 0x9c5   :  { %v474_v2 = vadd.f32 %v667_v58, %v473_v62 }
 0x9c7   :  { %v478_v5 = vsel %vm477_vm14, %v667_v58, %v474_v2 }
 0x9c8   :  { %v483_v33 = vsel %vm480_vm15, %v482_v4, %v478_v5 }
 0x9c9   :  { %v485_v6 = vmul.f32 %v746_v15, %v483_v33 }
 0x9cb   :  { %v486_v7 = vadd.f32 %v751_v18, %v485_v6 }
 0x9cd   :  { %487 = vrot.lane.b32.xlu1 %v486_v7, %s680_s15  ;;  %v490_v10 = vmul.f32 %v486_v7, %v439_v49 }
 0xa3f   :  { %v488_v8 = vpop.permute.xlu1 %487 }
 0xa40   :  { %v489_v9 = vmul.f32 %v488_v8, %v486_v7 }
 0xa42   :  { %492 = vrot.lane.b32.xlu2 %v489_v9, %s681_s20 }
 0xa9c   :  { %v493_v11 = vpop.permute.xlu2 %492 }
 0xa9d   :  { %v495_v12 = vadd.f32 %v493_v11, %v490_v10 }
 0xa9f   :  { %668 = vtanh.f32 %v495_v12 }
 0xaa5   :  { %v669_v13 = vpop.eup %668 }
 0xaa6   :  { %v497_v14 = vmul.f32 %v669_v13, %v488_v8 }
 0xaa8   :  { %614 = vmatmul.msk.f32.vlgmr.msra.gmra.mxu1 %vm157_vm6, %v497_v14 }
 0xb25   :  { %v518_v16 = vpop.f32.mrf.mxu1 }
 0xb26   :  { %v521_v17 = vadd.f32 %v518_v16, %v113_v63 }
 0xb28   :  { %v615_v19 = vmul.f32 -1.442695, %v521_v17 }
 0xb2a   :  { %670 = vpow2.f32 %v615_v19 }
 0xb30   :  { %v671_v20 = vpop.eup %670 }
 0xb31   :  { %v525_v21 = vadd.f32 1.0, %v671_v20 }
 0xb33   :  { %672 = vrcp.f32 %v525_v21  ;;  %v537_v28 = vand.u32 2147483648, %v525_v21  ;;  %v535_v23 = vand.u32 2147483647, %v525_v21  ;;  %vm531_vm1 = vweird.f32 %v525_v21 }
 0xb35   :  { %v538_v25 = vor.u32 1.1754944e-38, %v537_v28  ;;  %vm536_vm3 = vcmp.eq.f32.partialorder %v535_v23, 8.507059e+37 }
 0xb39   :  { %v673_v22 = vpop.eup %672 }
 0xb3a   :  { %v527_v26 = vmul.f32 %v673_v22, %v525_v21  ;;  %vm532_vm0 = vweird.f32 %v673_v22 }
 0xb3b   :  { %vm533_vm2 = vmor %vm531_vm1, %vm532_vm0 }
 0xb3c   :  { %v528_v27 = vsub.f32 1.0, %v527_v26 }
 0xb3e   :  { %v529_v29 = vmul.f32 %v673_v22, %v528_v27 }
 0xb40   :  { %v530_v24 = vadd.f32 %v673_v22, %v529_v29 }
 0xb42   :  { %v534_v31 = vsel %vm533_vm2, %v673_v22, %v530_v24 }
 0xb43   :  { %v539_v3 = vsel %vm536_vm3, %v538_v25, %v534_v31 }
 0xb44   :  { %v541_v34 = vmul.f32 %v746_v15, %v539_v3  ;;  %v626_v15 = vld [vmem:[%s904_s6] ss:$0 sm:$0xff] }
 0xb46   :  { %v542_v30 = vadd.f32 %v751_v18, %v541_v34 }
 0xb48   :  { %543 = vrot.lane.b32.xlu0 %v542_v30, %s680_s15  ;;  %v546_v37 = vmul.f32 %v542_v30, %v495_v12 }
 0xbba   :  { %v544_v32 = vpop.permute.xlu0 %543 }
 0xbbb   :  { %v545_v35 = vmul.f32 %v544_v32, %v542_v30 }
 0xbbd   :  { %548 = vrot.lane.b32.xlu1 %v545_v35, %s681_s20 }
 0xc2f   :  { %v549_v38 = vpop.permute.xlu1 %548 }
 0xc30   :  { %v551_v39 = vadd.f32 %v549_v38, %v546_v37 }
 0xc32   :  { %674 = vtanh.f32 %v551_v39 }
 0xc38   :  { %v675_v18 = vpop.eup %674 }
 0xc39   :  { %v553_v40 = vmul.f32 %v675_v18, %v544_v32 }
 0xc3b   :  { %v558_v41 = vmul.f32 %v626_v15, %v553_v40 }
 0xc3d   :  { %v559_v42 = vsel %vm157_vm6, %v558_v41, 0.0 }
 0xc3e   :  { %560 = vadd.xlane.f32.xlu2 %v559_v42 }
 0xcb1   :  { %v561_v43 = vpop.xlane.xlu2 %560 }
 0xcb2   :  { %v566_v44 = vadd.f32 %v627_v0, %v561_v43 }
 0xcb4   :  { %v616_v45 = vmul.f32 -1.442695, %v566_v44 }
 0xcb6   :  { %676 = vpow2.f32 %v616_v45 }
 0xcbc   :  { %v677_v46 = vpop.eup %676 }
 0xcbd   :  { %v570_v47 = vadd.f32 1.0, %v677_v46 }
 0xcbf   :  { %678 = vrcp.f32 %v570_v47  ;;  %v582_v51 = vand.u32 2147483648, %v570_v47  ;;  %v580_v53 = vand.u32 2147483647, %v570_v47  ;;  %vm576_vm5 = vweird.f32 %v570_v47 }
 0xcc1   :  { %v583_v55 = vor.u32 1.1754944e-38, %v582_v51  ;;  %vm581_vm8 = vcmp.eq.f32.partialorder %v580_v53, 8.507059e+37 }
 0xcc5   :  { %v679_v48 = vpop.eup %678 }
 0xcc6   :  { %v572_v49 = vmul.f32 %v679_v48, %v570_v47  ;;  %vm577_vm4 = vweird.f32 %v679_v48 }
 0xcc7   :  { %vm578_vm6 = vmor %vm576_vm5, %vm577_vm4 }
 0xcc8   :  { %v573_v50 = vsub.f32 1.0, %v572_v49 }
 0xcca   :  { %v574_v52 = vmul.f32 %v679_v48, %v573_v50 }
 0xccc   :  { %v575_v54 = vadd.f32 %v679_v48, %v574_v52 }
 0xcce   :  { %v579_v56 = vsel %vm578_vm6, %v679_v48, %v575_v54 }
 0xccf   :  { %v584_v57 = vsel %vm581_vm8, %v583_v55, %v579_v56 }
 0xcd0   :  { %587 = vst.msk [vmem:[%s906_s8] sm:$0xff] %vm586_vm7, %v584_v57 }

</bundles_post_ra>
